<compile_context>
chip_gen: v7x
topology: tpu7x:2x2x1
jax: 0.10.0
libtpu: 0.0.40
codegen_flags: <defaults>
</compile_context>

<pallas_src>
import functools

import jax
import jax.numpy as jnp
import numpy as np
from jax.experimental import pallas as pl
from jax.experimental.pallas import tpu as pltpu


def _max_margin_kernel(m, f1_ref, f2_ref, lab_ref, o_ref, acc_ref):
    """Max-margin loss for one (f1, f2 batch, label) triple.

    f1_ref  : (1, D)  query fingerprint vector (VMEM)
    f2_ref  : (B, D)  batch of fingerprint vectors (VMEM)
    lab_ref : (B, 1)  int32 labels in {0, 1} (VMEM)
    o_ref   : (1, 1)  scalar loss output (SMEM)
    acc_ref : (1, 1)  f32 VMEM scratch used to move the reduced value to SMEM
    """
    eps = jnp.float32(1e-8)

    f1 = f1_ref[...]          # (1, D)
    f2 = f2_ref[...]          # (B, D)
    lab = lab_ref[...]        # (B, 1) int32
    B = f2.shape[0]

    # ---- cosine similarities (VPU multiply + lane reduction; no MXU) ----
    n1_sq = jnp.sum(f1 * f1, axis=1, keepdims=True)        # (1, 1)
    n2_sq = jnp.sum(f2 * f2, axis=1, keepdims=True)        # (B, 1)
    dot_col = jnp.sum(f2 * f1, axis=1, keepdims=True)      # (B, 1)

    # cos = dot / max(||f1||*||f2||, eps)  (product clamp, as in the original
    # F.cosine_similarity semantics); done via one EUP rsqrt:
    #   1/max(||f1||*||f2||, eps) == rsqrt(max(n1_sq*n2_sq, eps^2)).
    inv_denom = jax.lax.rsqrt(jnp.maximum(n1_sq * n2_sq, eps * eps))  # (B, 1)
    cos_col = dot_col * inv_denom                                      # (B, 1)

    # ---- masks from integer labels ----
    pos_col = (lab == 1).astype(jnp.float32)                # (B, 1) positives (rows i)
    neg_col = (lab == 0).astype(jnp.float32)                # (B, 1) negatives

    # Column -> row layout for the tiny (B,1) vectors, done in-kernel
    # (eye mask + sublane reduce) so no second HBM copy of anything is needed.
    rows = jax.lax.broadcasted_iota(jnp.int32, (B, B), 0)
    cols = jax.lax.broadcasted_iota(jnp.int32, (B, B), 1)
    eye = rows == cols

    def to_row(v_col):  # (B, 1) -> (1, B)
        return jnp.sum(jnp.where(eye, v_col, jnp.float32(0.0)),
                       axis=0, keepdims=True)

    cos_row = to_row(cos_col)                               # (1, B)
    neg_row = to_row(neg_col)                               # (1, B)

    # ---- pairwise hinge: rows i = positives, cols j = negatives ----
    pair = jnp.maximum(cos_row - cos_col + jnp.float32(m), jnp.float32(0.0))  # (B, B)
    loss = jnp.sum(pair * pos_col * neg_row, keepdims=True)                   # (1, 1)

    # Reduce lands in a (1,1) VMEM scratch; scalar-read it and store via SMEM.
    acc_ref[...] = loss
    o_ref[0, 0] = acc_ref[0, 0]
    # TODO(synk): the PyTorch forward also calls print(loss); host-side print of
    # a traced value has no clean in-kernel equivalent and is omitted.


def max_margin_loss(fingerpvec1, fingerpvec2, label, m):
    """Pallas wrapper. fingerpvec1: (D,), fingerpvec2: (B, D), label: (B,)."""
    B, D = fingerpvec2.shape
    f1 = fingerpvec1.reshape(1, D).astype(jnp.float32)
    f2 = fingerpvec2.astype(jnp.float32)
    lab = label.astype(jnp.int32).reshape(B, 1)

    vmem = pl.BlockSpec(memory_space=pltpu.MemorySpace.VMEM)
    smem = pl.BlockSpec(memory_space=pltpu.MemorySpace.SMEM)

    out = pl.pallas_call(
        functools.partial(_max_margin_kernel, float(m)),
        out_shape=jax.ShapeDtypeStruct((1, 1), jnp.float32),
        in_specs=[vmem, vmem, vmem],
        out_specs=smem,
        scratch_shapes=[pltpu.VMEM((1, 1), jnp.float32)],
    )(f1, f2, lab)
    return out[0, 0]
    # TODO(synk): if this loss is evaluated for many (f1, batch) pairs, stack
    # the queries and add a grid axis to amortize the per-call launch overhead.


if __name__ == "__main__":
    key = jax.random.PRNGKey(0)
    k1, k2 = jax.random.split(key)

    B, D = 8, 32
    K, m = 5, 0.5  # K is unused by forward (matches the PyTorch module)

    fingerpvec1 = jax.random.normal(k1, (D,), dtype=jnp.float32)
    fingerpvec2 = jax.random.normal(k2, (B, D), dtype=jnp.float32)
    label = jnp.array([1, 0, 1, 1, 0, 0, 1, 0], dtype=jnp.int32)

    loss = jax.block_until_ready(max_margin_loss(fingerpvec1, fingerpvec2, label, m))

    # Pure-NumPy reference (mirrors the PyTorch forward exactly).
    f1_np = np.asarray(fingerpvec1)
    f2_np = np.asarray(fingerpvec2)
    lab_np = np.asarray(label)

    def _cos(a, b):
        return float(np.dot(a, b) / max(np.linalg.norm(a) * np.linalg.norm(b), 1e-8))

    pos = sorted(_cos(f1_np, f2_np[i]) for i in range(B) if lab_np[i] == 1)
    neg = sorted((_cos(f1_np, f2_np[i]) for i in range(B) if lab_np[i] == 0), reverse=True)
    ref = sum(max(0.0, n - p + m) for p in pos for n in neg)

    assert np.allclose(float(loss), ref, rtol=1e-5, atol=1e-5), (float(loss), ref)
    print("KERNEL_OK")
</pallas_src>

<mosaic_0001>
module attributes {stable_mosaic.version = 11 : i64} {
  func.func @_max_margin_kernel(%arg0: memref<1x32xf32, #tpu.memory_space<vmem>>, %arg1: memref<8x32xf32, #tpu.memory_space<vmem>>, %arg2: memref<8x1xi32, #tpu.memory_space<vmem>>, %arg3: memref<1x1xf32, #tpu.memory_space<smem>>, %arg4: memref<1x1xf32, #tpu.memory_space<vmem>>) attributes {dimension_semantics = [], scalar_prefetch = 0 : i64, scratch_operands = 1 : i64, tpu.core_type = #tpu.core_type<tc>} {
    %c0 = arith.constant 0 : index
    %c0_0 = arith.constant 0 : index
    %0 = vector.load %arg0[%c0, %c0_0] : memref<1x32xf32, #tpu.memory_space<vmem>>, vector<1x32xf32>
    %c0_1 = arith.constant 0 : index
    %c0_2 = arith.constant 0 : index
    %1 = vector.load %arg1[%c0_1, %c0_2] : memref<8x32xf32, #tpu.memory_space<vmem>>, vector<8x32xf32>
    %c0_3 = arith.constant 0 : index
    %c0_4 = arith.constant 0 : index
    %2 = vector.load %arg2[%c0_3, %c0_4] : memref<8x1xi32, #tpu.memory_space<vmem>>, vector<8x1xi32>
    %3 = arith.mulf %0, %0 : vector<1x32xf32>
    %cst = arith.constant dense<0.000000e+00> : vector<1xf32>
    %4 = vector.multi_reduction <add>, %3, %cst [1] : vector<1x32xf32> to vector<1xf32>
    %5 = vector.shape_cast %4 : vector<1xf32> to vector<1x1xf32>
    %6 = arith.mulf %1, %1 : vector<8x32xf32>
    %cst_5 = arith.constant dense<0.000000e+00> : vector<8xf32>
    %7 = vector.multi_reduction <add>, %6, %cst_5 [1] : vector<8x32xf32> to vector<8xf32>
    %8 = vector.shape_cast %7 : vector<8xf32> to vector<8x1xf32>
    %9 = vector.broadcast %0 : vector<1x32xf32> to vector<8x32xf32>
    %10 = arith.mulf %1, %9 : vector<8x32xf32>
    %cst_6 = arith.constant dense<0.000000e+00> : vector<8xf32>
    %11 = vector.multi_reduction <add>, %10, %cst_6 [1] : vector<8x32xf32> to vector<8xf32>
    %12 = vector.shape_cast %11 : vector<8xf32> to vector<8x1xf32>
    %13 = vector.broadcast %5 : vector<1x1xf32> to vector<8x1xf32>
    %14 = arith.mulf %13, %8 : vector<8x1xf32>
    %cst_7 = arith.constant 9.99999993E-9 : f32
    %cst_8 = arith.constant 9.99999993E-9 : f32
    %15 = arith.mulf %cst_7, %cst_8 : f32
    %16 = vector.broadcast %15 : f32 to vector<8x1xf32>
    %17 = arith.maximumf %14, %16 : vector<8x1xf32>
    %18 = math.rsqrt %17 : vector<8x1xf32>
    %19 = arith.mulf %12, %18 : vector<8x1xf32>
    %c1_i32 = arith.constant 1 : i32
    %20 = vector.broadcast %c1_i32 : i32 to vector<8x1xi32>
    %21 = arith.cmpi eq, %2, %20 : vector<8x1xi32>
    %22 = arith.extui %21 : vector<8x1xi1> to vector<8x1xi32>
    %23 = arith.sitofp %22 : vector<8x1xi32> to vector<8x1xf32>
    %c0_i32 = arith.constant 0 : i32
    %24 = vector.broadcast %c0_i32 : i32 to vector<8x1xi32>
    %25 = arith.cmpi eq, %2, %24 : vector<8x1xi32>
    %26 = arith.extui %25 : vector<8x1xi1> to vector<8x1xi32>
    %27 = arith.sitofp %26 : vector<8x1xi32> to vector<8x1xf32>
    %28 = tpu.iota {dimensions = array<i32: 0>} : vector<8x8xi32>
    %29 = tpu.iota {dimensions = array<i32: 1>} : vector<8x8xi32>
    %30 = arith.cmpi eq, %28, %29 : vector<8x8xi32>
    %cst_9 = arith.constant 0.000000e+00 : f32
    %31 = vector.shape_cast %19 : vector<8x1xf32> to vector<8x1xf32>
    %32 = vector.broadcast %31 : vector<8x1xf32> to vector<8x8xf32>
    %33 = vector.broadcast %cst_9 : f32 to vector<8x8xf32>
    %34 = arith.select %30, %32, %33 : vector<8x8xi1>, vector<8x8xf32>
    %cst_10 = arith.constant dense<0.000000e+00> : vector<8xf32>
    %35 = vector.multi_reduction <add>, %34, %cst_10 [0] : vector<8x8xf32> to vector<8xf32>
    %36 = vector.shape_cast %35 : vector<8xf32> to vector<1x8xf32>
    %cst_11 = arith.constant 0.000000e+00 : f32
    %37 = vector.shape_cast %27 : vector<8x1xf32> to vector<8x1xf32>
    %38 = vector.broadcast %37 : vector<8x1xf32> to vector<8x8xf32>
    %39 = vector.broadcast %cst_11 : f32 to vector<8x8xf32>
    %40 = arith.select %30, %38, %39 : vector<8x8xi1>, vector<8x8xf32>
    %cst_12 = arith.constant dense<0.000000e+00> : vector<8xf32>
    %41 = vector.multi_reduction <add>, %40, %cst_12 [0] : vector<8x8xf32> to vector<8xf32>
    %42 = vector.shape_cast %41 : vector<8xf32> to vector<1x8xf32>
    %43 = vector.broadcast %36 : vector<1x8xf32> to vector<8x8xf32>
    %44 = vector.broadcast %19 : vector<8x1xf32> to vector<8x8xf32>
    %45 = arith.subf %43, %44 : vector<8x8xf32>
    %cst_13 = arith.constant 5.000000e-01 : f32
    %46 = vector.broadcast %cst_13 : f32 to vector<8x8xf32>
    %47 = arith.addf %45, %46 : vector<8x8xf32>
    %cst_14 = arith.constant 0.000000e+00 : f32
    %48 = vector.broadcast %cst_14 : f32 to vector<8x8xf32>
    %49 = arith.maximumf %47, %48 : vector<8x8xf32>
    %50 = vector.broadcast %23 : vector<8x1xf32> to vector<8x8xf32>
    %51 = arith.mulf %49, %50 : vector<8x8xf32>
    %52 = vector.broadcast %42 : vector<1x8xf32> to vector<8x8xf32>
    %53 = arith.mulf %51, %52 : vector<8x8xf32>
    %54 = vector.shape_cast %53 : vector<8x8xf32> to vector<1x8x8xf32>
    %cst_15 = arith.constant dense<0.000000e+00> : vector<1xf32>
    %55 = vector.multi_reduction <add>, %54, %cst_15 [1, 2] : vector<1x8x8xf32> to vector<1xf32>
    %56 = vector.shape_cast %55 : vector<1xf32> to vector<1x1x1xf32>
    %57 = vector.extract %56[0, 0, 0] : f32 from vector<1x1x1xf32>
    %58 = vector.broadcast %57 : f32 to vector<1x1xf32>
    %c0_16 = arith.constant 0 : index
    %c0_17 = arith.constant 0 : index
    %59 = vector.load %arg4[%c0_16, %c0_17] : memref<1x1xf32, #tpu.memory_space<vmem>>, vector<1x1xf32>
    tpu.vector_store %arg4[%c0_16, %c0_17], %58 {strides = array<i32>} : memref<1x1xf32, #tpu.memory_space<vmem>>, vector<1x1xf32>,
    %c0_18 = arith.constant 0 : index
    %c0_19 = arith.constant 0 : index
    %60 = vector.load %arg4[%c0_18, %c0_19] : memref<1x1xf32, #tpu.memory_space<vmem>>, vector<1x1xf32>
    %61 = vector.extract %60[0, 0] : f32 from vector<1x1xf32>
    %c0_20 = arith.constant 0 : index
    %c0_21 = arith.constant 0 : index
    %62 = memref.load %arg3[%c0_20, %c0_21] : memref<1x1xf32, #tpu.memory_space<smem>>
    memref.store %61, %arg3[%c0_20, %c0_21] : memref<1x1xf32, #tpu.memory_space<smem>>
    return
  }
}

</mosaic_0001>

<bundles_post_ra>
// kernel: tpu_custom_call.1
= control target key start
LH: loop header
LB: loop body
LE: loop exit
PB: predicated region body
PF: predicated region fallthrough
CT: control target
= control target key end

     0   :  { %vm19_vm0 = vcmask 253952   ;;  %v29_v2 = vlaneseq  ;;  %v144_v5 = vmov 0   ;;  %s191_s0 = inlined_call_operand.vmem [shape: f32[1,32], index: 0, kind: input, shape index: {}]   ;;  %s192_s1 = inlined_call_operand.vmem [shape: f32[8,32], index: 1, kind: input, shape index: {}]   ;;  %s193_s2 = inlined_call_operand.vmem [shape: s32[8,1], index: 2, kind: input, shape index: {}]   ;;  %s194_s3 = inlined_call_operand.hbm [shape: f32[1,1], index: 3, kind: output, shape index: {}]  }
   0x1   :  { %v15_v0 = vld [vmem:[%s191_s0] sm:$0x1]  ;;  %128 = vset.pattern.permute.xlu1 %v144_v5  ;;  %129 = vset.pattern.permute.xlu0 %v144_v5 }
   0x2   :  { %v16_v1 = vld [vmem:[%s192_s1] sm:$0xff]  ;;  %v18_v3 = vmul.f32 %v15_v0, %v15_v0 }
   0x3   :  { %v23_v4 = vmul.f32 %v16_v1, %v16_v1 }
   0x4   :  { %8 = vsyncpa [#allocation4], 0  ;;  %vm24_vm1 = vcmask 261120   ;;  %v30_v6 = vshrl.u32 %v29_v2, 7  ;;  %v20_v7 = vsel %vm19_vm0, %v18_v3, 0.0  ;;  %v17_v13 = vld [vmem:[%s193_s2] sm:$0xff] }
   0x5   :  { %21 = vadd.xlane.f32.xlu0 %v20_v7  ;;  %v25_v9 = vsel %vm24_vm1, %v23_v4, 0.0  ;;  %vm49_vm2 = vcmp.eq.s32.totalorder %v17_v13, 0  ;;  %vm46_vm3 = vcmp.eq.s32.totalorder %v17_v13, 1  ;;  %v145_v14 = vmov 0.0   ;;  %s132_s19 = scalar_lea.hbm %s194_s3, 16 }
   0x6   :  { %v31_v8 = vsub.s32 0, %v30_v6  ;;  %v120_v15 = vsel %vm49_vm2, 1.0, %v145_v14  ;;  %v119_v16 = vsel %vm46_vm3, 1.0, %v145_v14  ;;  %v55_v17 = vand.u32 127, %v29_v2  ;;  %p133_p0 = scmp.ne.s32.totalorder %s194_s3, %s132_s19  ;;  %p136_p1 = scmp.lt.u32.totalorder %s132_s19, %s194_s3 }
   0x7   :  { %vm58_vm5 = vcmask 64512   ;;  %vm100_vm6 = vcmask 0  }
   0x8   :  { %v32_v10 = vrot.slane %v15_v0, %v31_v8  ;;  %vm56_vm4 = vcmp.eq.s32.totalorder %v30_v6, %v55_v17  ;;  %p138_p2 = pnand %p136_p1, %p133_p0 }
   0x9   :  { %26 = vadd.xlane.f32.xlu0 %v25_v9 }
   0xa   :  { %v34_v11 = vmul.f32 %v32_v10, %v16_v1 }
   0xc   :  { %v35_v12 = vsel %vm24_vm1, %v34_v11, 0.0 }
   0xd   :  { %36 = vadd.xlane.f32.xlu1 %v35_v12 }
  0x1e   :  { %68 = vperm.xlu1 %128, %v120_v15  }
  0x1f   :  { %84 = vperm.xlu0 %129, %v119_v16  }
  0x92   :  { %v22_v18 = vpop.xlane.xlu0 %21 }
  0x93   :  { %v41_v19 = vrot.slane %v22_v18, %v31_v8 }
  0x96   :  { %v27_v20 = vpop.xlane.xlu0 %26 }
  0x97   :  { %v42_v21 = vmul.f32 %v41_v19, %v27_v20 }
  0x99   :  { %v43_v22 = vmax.f32 %v42_v21, 1e-16 }
  0x9a   :  { %v37_v23 = vpop.xlane.xlu1 %36 }
  0x9b   :  { %130 = vrsqrt.f32 %v43_v22 }
  0x9e   :  { %v69_v24 = vpop.permute.xlu1 %68  ;;  %v85_v44 = vpop.permute.xlu0 %84 }
  0x9f   :  { %v71_v25 = vsel %vm56_vm4, %v69_v24, 0.0 }
  0xa0   :  { %v72_v27 = vsel %vm58_vm5, %v71_v25, 0.0 }
  0xa1   :  { %v73_v30 = vrot.slane %v72_v27, 4 }
  0xa3   :  { %v74_v34 = vadd.f32 %v73_v30, %v72_v27 }
  0xa5   :  { %v131_v26 = vpop.eup %130  ;;  %v75_v37 = vrot.slane %v74_v34, 2 }
  0xa6   :  { %v45_v28 = vmul.f32 %v131_v26, %v37_v23 }
  0xa7   :  { %v76_v39 = vadd.f32 %v75_v37, %v74_v34 }
  0xa8   :  { %v57_v29 = vsel %vm56_vm4, %v45_v28, 0.0 }
  0xa9   :  { %v59_v31 = vsel %vm58_vm5, %v57_v29, 0.0  ;;  %v77_v43 = vrot.slane %v76_v39, 1 }
  0xaa   :  { %v60_v32 = vrot.slane %v59_v31, 4 }
  0xab   :  { %v78_v47 = vadd.f32 %v77_v43, %v76_v39 }
  0xac   :  { %v61_v33 = vadd.f32 %v60_v32, %v59_v31 }
  0xae   :  { %v62_v35 = vrot.slane %v61_v33, 2 }
  0xb0   :  { %v63_v36 = vadd.f32 %v62_v35, %v61_v33 }
  0xb2   :  { %v64_v38 = vrot.slane %v63_v36, 1 }
  0xb4   :  { %v65_v40 = vadd.f32 %v64_v38, %v63_v36 }
  0xb6   :  { %v79_v41 = vsub.f32 %v65_v40, %v45_v28 }
  0xb8   :  { %v80_v42 = vadd.f32 0.5, %v79_v41 }
  0xba   :  { %v81_v45 = vmax.f32 %v80_v42, 0.0 }
  0xbc   :  { %v87_v46 = vmul.f32 %v85_v44, %v81_v45 }
  0xbe   :  { %v88_v48 = vmul.f32 %v87_v46, %v78_v47 }
  0xc0   :  { %v89_v49 = vsel %vm58_vm5, %v88_v48, 0.0 }
  0xc1   :  { %90 = vadd.xlane.f32.xlu1 %v89_v49 }
 0x14e   :  { %v91_v50 = vpop.xlane.xlu1 %90 }
 0x14f   :  { %v92_v51 = vrot.slane %v91_v50, 4 }
 0x151   :  { %v93_v52 = vadd.f32 %v92_v51, %v91_v50 }
 0x153   :  { %v94_v53 = vrot.slane %v93_v52, 2 }
 0x155   :  { %v95_v54 = vadd.f32 %v94_v53, %v93_v52 }
 0x157   :  { %v96_v55 = vrot.slane %v95_v54, 1 }
 0x159   :  { %v97_v56 = vadd.f32 %v96_v55, %v95_v54 }
 0x15b   :  { %121 = vpush %v97_v56 }
 0x18c   :  { %s122_s2 = spop %121 }
 0x18d   :  { %v99_v57 = vstv %s122_s2 }
 0x18e   :  { %101 = vst.msk [vmem:[#allocation2] sm:$0x1] %vm100_vm6, %v99_v57 }
 0x195   :  { %v102_v58 = vld [vmem:[#allocation2] sm:$0x1] }
 0x196   :  { %123 = vpush %v102_v58 }
 0x1c7   :  { %s124_s16 = spop %123 }
 0x1c8   :  { %105 = sst [smem:[#allocation3]] %s124_s16 }
 0x1c9   :  { %141 = shalt.err (!%p138_p2)
}
 0x1ca   :  { %s146_s24 = smov [#allocation3]  }
 0x1cb   :  { %113 = dma.smem_to_hbm %s146_s24, 16, %s194_s3, [#allocation4]  }
 0x1cc   :  { %142 = dma.done.wait [#allocation4], 16  }
 0x1cd   :  { %143 = vsyncadd [#allocation4], 4294967280 }
 0x1ce   :  { %117 = sfence }
 0x1cf   :  { %118 = vsyncpa [#allocation4], 1 }

</bundles_post_ra>
